<compile_context>
chip_gen: v5e
topology: v5e:2x2
jax: 0.10.0
libtpu: 0.0.40
codegen_flags: <defaults>
</compile_context>

<pallas_src>
import jax
import jax.numpy as jnp
from jax.experimental import pallas as pl
from jax.experimental.pallas import tpu as pltpu


_VMEM_LIMIT_BYTES = 48 << 20      # safe on v5e/v6e (128 MiB phys) and v7x (64 MiB phys)
_TARGET_BLOCK_BYTES = 4 << 20     # 4 MiB blocks: per-step overhead <~10% even at v7x BW
_MIN_PALLAS_BYTES = 256 * 1024    # below this, XLA's fused multiply wins on launch cost


def _scale_kernel(scale_ref, x_ref, o_ref):
    # scale lives in SMEM as a (1,1) f32; scalar load + broadcast + VPU multiply
    # are fully hidden under the HBM-bound DMA stream.
    o_ref[...] = (x_ref[...] * scale_ref[0, 0]).astype(o_ref.dtype)


def _pick_tile_rows(rows: int, cols: int, itemsize: int, sublane: int) -> int:
    """Row-tile height: ~4 MiB blocks, >= ~4 pipeline steps, sublane-aligned."""
    if rows <= sublane:
        return rows                                   # full-dim block: always legal
    tile_r = max(1, _TARGET_BLOCK_BYTES // (cols * itemsize))
    tile_r = min(tile_r, pl.cdiv(rows, 4))            # keep pipelining for mid-sized x
    tile_r = max(sublane, (tile_r // sublane) * sublane)
    return min(tile_r, rows)


def _run_scale_2d(x2d: jax.Array, scale, tile_r: int) -> jax.Array:
    rows, cols = x2d.shape
    n = rows * cols
    itemsize = jnp.dtype(x2d.dtype).itemsize
    scale_arr = jnp.full((1, 1), scale, dtype=jnp.float32)

    return pl.pallas_call(
        _scale_kernel,
        out_shape=jax.ShapeDtypeStruct((rows, cols), x2d.dtype),
        grid=(pl.cdiv(rows, tile_r),),
        in_specs=[
            pl.BlockSpec(memory_space=pltpu.MemorySpace.SMEM),     # (1,1) scale scalar
            pl.BlockSpec((tile_r, cols), lambda i: (i, 0)),
        ],
        out_specs=pl.BlockSpec((tile_r, cols), lambda i: (i, 0)),
        compiler_params=pltpu.CompilerParams(
            # TODO(synk): verify in xprof that both v7x TensorCores are used;
            # if not, switch the row axis to pltpu.CORE_PARALLEL.
            dimension_semantics=("parallel",),
            vmem_limit_bytes=_VMEM_LIMIT_BYTES,
        ),
        cost_estimate=pl.CostEstimate(
            flops=n, transcendentals=0, bytes_accessed=2 * n * itemsize),
    )(scale_arr, x2d)


def scale_forward(x: jax.Array, scale, *, min_pallas_bytes: int = _MIN_PALLAS_BYTES) -> jax.Array:
    """Pallas equivalent of Scale.forward: returns x * scale."""
    orig_shape = x.shape
    dtype = x.dtype
    n = x.size
    itemsize = jnp.dtype(dtype).itemsize

    # TODO(synk): PyTorch promotes integer tensors to float for x * 0.5; here
    # integer inputs keep their dtype (truncating) -- exact match for floats.

    if n == 0 or x.ndim == 0 or n * itemsize <= min_pallas_bytes:
        # Tiny tensors: pallas_call fixed cost dominates; let XLA fuse it.
        return (x * jnp.asarray(scale, dtype=jnp.float32)).astype(dtype)

    # dtype-aware packed sublane count: 8 (f32), 16 (bf16), 32 (int8/fp8)
    sublane = max(8, 32 // itemsize)

    if n % 128 == 0:
        # --- main path: lane-dense flat slab, no copies ---
        lane = 128
        for cand in range(4096, 127, -128):
            if n % cand == 0 and n // cand >= sublane:
                lane = cand                        # widest lane that still fills sublanes
                break
        rows = n // lane
        x2d = x.reshape(rows, lane)                # contiguous reshape: free
        tile_r = _pick_tile_rows(rows, lane, itemsize, sublane)
        return _run_scale_2d(x2d, scale, tile_r).reshape(orig_shape)

    # --- ragged path: numel not a multiple of 128 ---
    # Block in the (collapsed) original shape: last dim kept whole (full-dim
    # blocks are always legal), rows tiled with a cdiv grid; Pallas masks the
    # ragged last block.  No pad/copy/slice traffic.
    cols = orig_shape[-1]
    rows = n // cols
    if sublane * cols * itemsize > (8 << 20):
        # Even a minimum-height block would blow VMEM; XLA's fused elementwise
        # op is already at the HBM roofline for such shapes.
        return (x * jnp.asarray(scale, dtype=jnp.float32)).astype(dtype)
    x2d = x.reshape(rows, cols)
    tile_r = _pick_tile_rows(rows, cols, itemsize, sublane)
    return _run_scale_2d(x2d, scale, tile_r).reshape(orig_shape)


if __name__ == "__main__":
    key = jax.random.PRNGKey(0)
    k1, k2, k3 = jax.random.split(key, 3)
    scale = 0.5  # deterministic constructor argument Scale(scale=0.5)

    # 1) small NCHW-like input typical of Scale usage -- default path (XLA fast path)
    x_small = jax.random.normal(k1, (2, 4, 16, 16), dtype=jnp.float32)
    y_small = jax.block_until_ready(scale_forward(x_small, scale))
    assert y_small.shape == x_small.shape and y_small.dtype == x_small.dtype
    assert jnp.allclose(y_small, x_small * scale, atol=1e-6, rtol=1e-6)

    # 2) same input forced through the Pallas kernel (single-block grid)
    y_small_pl = jax.block_until_ready(scale_forward(x_small, scale, min_pallas_bytes=0))
    assert y_small_pl.shape == x_small.shape and y_small_pl.dtype == x_small.dtype
    assert jnp.allclose(y_small_pl, x_small * scale, atol=1e-6, rtol=1e-6)

    # 3) larger input: streaming multi-block Pallas path (wide lanes, 4 grid steps)
    x_big = jax.random.normal(k2, (8, 16, 64, 64), dtype=jnp.float32)
    y_big = jax.block_until_ready(scale_forward(x_big, scale))
    assert y_big.shape == x_big.shape and y_big.dtype == x_big.dtype
    assert jnp.allclose(y_big, x_big * scale, atol=1e-6, rtol=1e-6)

    # 4) ragged numel (not a multiple of 128): full-last-dim blocks, masked edge
    x_rag = jax.random.normal(k3, (3, 5, 7, 11), dtype=jnp.float32)
    y_rag = jax.block_until_ready(scale_forward(x_rag, scale, min_pallas_bytes=0))
    assert y_rag.shape == x_rag.shape and y_rag.dtype == x_rag.dtype
    assert jnp.allclose(y_rag, x_rag * scale, atol=1e-6, rtol=1e-6)

    print("KERNEL_OK")
</pallas_src>

<mosaic_0001>
module attributes {stable_mosaic.version = 11 : i64} {
  func.func @_scale_kernel(%arg0: i32, %arg1: memref<1x1xf32, #tpu.memory_space<smem>>, %arg2: memref<8x256xf32, #tpu.memory_space<vmem>>, %arg3: memref<8x256xf32, #tpu.memory_space<vmem>>) attributes {dimension_semantics = [#tpu.dimension_semantics<parallel>], iteration_bounds = array<i64: 1>, scalar_prefetch = 0 : i64, scratch_operands = 0 : i64, tpu.core_type = #tpu.core_type<tc>, window_params = [{transform_indices = @transform_0, window_bounds = array<i64: 1, 1>}, {transform_indices = @transform_1, window_bounds = array<i64: 8, 256>}, {transform_indices = @transform_2, window_bounds = array<i64: 8, 256>}]} {
    %c0 = arith.constant 0 : index
    %c0_0 = arith.constant 0 : index
    %0 = vector.load %arg2[%c0, %c0_0] : memref<8x256xf32, #tpu.memory_space<vmem>>, vector<8x256xf32>
    %c0_1 = arith.constant 0 : index
    %c0_2 = arith.constant 0 : index
    %1 = memref.load %arg1[%c0_1, %c0_2] : memref<1x1xf32, #tpu.memory_space<smem>>
    %2 = vector.broadcast %1 : f32 to vector<8x256xf32>
    %3 = arith.mulf %0, %2 : vector<8x256xf32>
    %c0_3 = arith.constant 0 : index
    %c0_4 = arith.constant 0 : index
    %4 = vector.load %arg3[%c0_3, %c0_4] : memref<8x256xf32, #tpu.memory_space<vmem>>, vector<8x256xf32>
    tpu.vector_store %arg3[%c0_3, %c0_4], %3 {strides = array<i32>} : memref<8x256xf32, #tpu.memory_space<vmem>>, vector<8x256xf32>,
    return
  }
  func.func @transform_0(%arg0: i32) -> (i32, i32) {
    %c0_i32 = arith.constant 0 : i32
    %c0_i32_0 = arith.constant 0 : i32
    %c0_i32_1 = arith.constant 0 : i32
    return %c0_i32, %c0_i32_0 : i32, i32
  }
  func.func @transform_1(%arg0: i32) -> (i32, i32) {
    %c0_i32 = arith.constant 0 : i32
    %c0_i32_0 = arith.constant 0 : i32
    return %arg0, %c0_i32 : i32, i32
  }
  func.func @transform_2(%arg0: i32) -> (i32, i32) {
    %c0_i32 = arith.constant 0 : i32
    %c0_i32_0 = arith.constant 0 : i32
    return %arg0, %c0_i32 : i32, i32
  }
}

</mosaic_0001>

<bundles_post_ra>
// kernel: tpu_custom_call.1
= control target key start
LH: loop header
LB: loop body
LE: loop exit
PB: predicated region body
PF: predicated region fallthrough
CT: control target
= control target key end

     0   :  { %8 = vsyncpa [#allocation4], 0  ;;  %s132_s0 = inlined_call_operand.<no memory space> [shape: f32[1,1], index: 0, kind: input, shape index: {}]   ;;  %s133_s1 = inlined_call_operand.hbm [shape: f32[8,256], index: 1, kind: input, shape index: {}]   ;;  %s134_s2 = inlined_call_operand.hbm [shape: f32[8,256], index: 2, kind: output, shape index: {}]  }
   0x1   :  { %9 = vsyncpa [#allocation5], 0  ;;  %s17_s11 = sshll.u32 %s133_s1, 4  ;;  %s106_s12 = smov [#allocation3]   ;;  %s18_s11 = int_to_ptr.hbm [resolvable:$true] %s17_s11 }
   0x2   :  { %s19_s13 = sshll.u32 %s106_s12, 4  ;;  %s20_s13 = int_to_ptr.vmem [resolvable:$true] %s19_s13 }
   0x3   :  { %22 = dma.hbm_to_vmem [thread:$0]  %s18_s11, 256, %s20_s13, [#allocation4]  }
   0x4   :  { %102 = dma.done.wait [#allocation4], 256  }
   0x5   :  { %103 = vsyncadd [#allocation4], 4294967040  ;;  %v30_v0 = vstv %s132_s0  ;;  %s107_s16 = smov [#allocation6]   ;;  %s42_s20 = sshll.u32 %s134_s2, 4  ;;  %v27_v1 = vld [vmem:[#allocation3] sm:$0xff]  ;;  %v28_v2 = vld [vmem:[#allocation3 + $0x8] sm:$0xff]  ;;  %s43_s20 = int_to_ptr.hbm [resolvable:$true] %s42_s20 }
   0x6   :  { %s40_s17 = sshll.u32 %s107_s16, 4  ;;  %v31_v3 = vmul.f32 %v30_v0, %v27_v1  ;;  %v32_v4 = vmul.f32 %v30_v0, %v28_v2  ;;  %s41_s17 = int_to_ptr.vmem [resolvable:$true] %s40_s17 }
   0x8   :  { %33 = vst [vmem:[#allocation6] sm:$0xff] %v31_v3 }
   0x9   :  { %34 = vst [vmem:[#allocation6 + $0x8] sm:$0xff] %v32_v4 }
   0xa   :  { %45 = dma.vmem_to_hbm [thread:$0]  %s41_s17, 256, %s43_s20, [#allocation5]  }
   0xb   :  { %104 = dma.done.wait [#allocation5], 256  }
   0xc   :  { %105 = vsyncadd [#allocation5], 4294967040 }
   0xd   :  { %50 = vsyncpa [#allocation4], 1 }
   0xe   :  { %51 = vsyncpa [#allocation5], 1 }

</bundles_post_ra>
